<compile_context>
chip_gen: v6e
topology: v6e:2x2x1
jax: 0.10.0
libtpu: 0.0.40
codegen_flags: <defaults>
</compile_context>

<pallas_src>
import jax
import jax.numpy as jnp
from jax.experimental import pallas as pl
from jax.experimental.pallas import tpu as pltpu


# --------------------------------------------------------------------------
# Kernels
# --------------------------------------------------------------------------
def _ee_softmax_kernel(expt_ref, x_ref, o_ref):
    # expt_ref: SMEM (1,) scalar-prefetch ref; x_ref/o_ref: (N, TILE_D) VMEM tiles.
    t = expt_ref[0]
    scaled = t * x_ref[...].astype(jnp.float32)
    m = jnp.max(scaled, axis=0, keepdims=True)      # per-column max (softmax axis = 0)
    e = jnp.exp(scaled - m)
    s = jnp.sum(e, axis=0, keepdims=True)
    # Reciprocal only on the (1, TILE_D) reduced row + one broadcast multiply.
    # approx=False keeps full f32 precision; this kernel is HBM-bound anyway.
    inv = pl.reciprocal(s, approx=False)
    o_ref[...] = (e * inv).astype(o_ref.dtype)


def _make_stats_kernel(n, tile_n):
    """Pass 1 of the large-N path: online per-column max & sum-exp over N tiles."""

    def kernel(expt_ref, x_ref, stats_ref, m_sc, l_sc):
        i = pl.program_id(1)                        # N (reduction) axis, last in grid

        @pl.when(i == 0)
        def _():
            m_sc[...] = jnp.full(m_sc.shape, -jnp.inf, dtype=m_sc.dtype)
            l_sc[...] = jnp.zeros(l_sc.shape, dtype=l_sc.dtype)

        t = expt_ref[0]
        scaled = t * x_ref[...].astype(jnp.float32)
        # Mask out-of-bounds rows of the partial last N tile so they cannot
        # contaminate valid columns' max / sum-exp.
        row = i * tile_n + jax.lax.broadcasted_iota(jnp.int32, scaled.shape, 0)
        scaled = jnp.where(row < n, scaled, -jnp.inf)

        m_blk = jnp.max(scaled, axis=0, keepdims=True)
        m_new = jnp.maximum(m_sc[...], m_blk)
        l_sc[...] = (l_sc[...] * jnp.exp(m_sc[...] - m_new)
                     + jnp.sum(jnp.exp(scaled - m_new), axis=0, keepdims=True))
        m_sc[...] = m_new

        @pl.when(i == pl.num_programs(1) - 1)
        def _():
            stats_ref[...] = jnp.concatenate([m_sc[...], l_sc[...]], axis=0)

    return kernel


def _normalize_kernel(expt_ref, stats_ref, x_ref, o_ref):
    """Pass 2 of the large-N path: out = exp(t*x - m) / l."""
    t = expt_ref[0]
    scaled = t * x_ref[...].astype(jnp.float32)
    m = stats_ref[0:1, :]
    inv = pl.reciprocal(stats_ref[1:2, :], approx=False)
    o_ref[...] = (jnp.exp(scaled - m) * inv).astype(o_ref.dtype)


# --------------------------------------------------------------------------
# Host-side helpers
# --------------------------------------------------------------------------
_MIB = 1024 * 1024


def _vmem_capacity_bytes():
    """Physical per-core VMEM; conservative (v7x = 64 MiB) if the query fails."""
    try:
        return int(pltpu.get_tpu_info().vmem_capacity_bytes)
    except Exception:
        return 64 * _MIB


def _round_up_128(v):
    return pl.cdiv(v, 128) * 128


def _single_pass(x2d, expt_arr, n, d, itemsize, pipeline_budget, phys, tile_d=None):
    d128 = _round_up_128(d)
    if tile_d is None:
        lane_target = 4 * _MIB                                     # per input buffer
        lane_tile = (lane_target // (n * itemsize)) // 128 * 128
        cap_tile = (pipeline_budget // (4 * n * itemsize)) // 128 * 128
        tile_d = max(128, min(lane_tile, cap_tile))
        tile_d = min(tile_d, d128)
        # v7x megacore: make sure the "parallel" axis has >= 2 programs when
        # there is enough work to split.
        if d >= 256:
            tile_d = min(tile_d, _round_up_128(pl.cdiv(d, 2)))
        tile_d = max(128, tile_d)

    grid = (pl.cdiv(d, tile_d),)
    footprint = 4 * n * tile_d * itemsize            # 2 bufs x (in + out)
    vmem_limit = int(min(phys, footprint + 16 * _MIB))

    return pl.pallas_call(
        _ee_softmax_kernel,
        out_shape=jax.ShapeDtypeStruct((n, d), x2d.dtype),
        grid_spec=pltpu.PrefetchScalarGridSpec(
            num_scalar_prefetch=1,                   # expt scalar lands in SMEM
            grid=grid,
            in_specs=[pl.BlockSpec((n, tile_d), lambda j, expt_sm: (0, j))],
            out_specs=pl.BlockSpec((n, tile_d), lambda j, expt_sm: (0, j)),
        ),
        compiler_params=pltpu.CompilerParams(
            dimension_semantics=("parallel",),       # every column independent
            vmem_limit_bytes=vmem_limit,
        ),
        cost_estimate=pl.CostEstimate(
            flops=3 * n * d,
            transcendentals=n * d,
            bytes_accessed=2 * n * d * itemsize,
        ),
    )(expt_arr, x2d)


def _two_pass(x2d, expt_arr, n, d, itemsize, pipeline_budget, phys,
              tile_n=None, tile_d=None):
    d128 = _round_up_128(d)
    if tile_d is None:
        tile_d = min(512, d128)
        if d >= 256:
            tile_d = min(tile_d, _round_up_128(pl.cdiv(d, 2)))
    if tile_n is None:
        tile_n = pipeline_budget // (4 * tile_d * itemsize)
        tile_n = max(8, (tile_n // 8) * 8)
    if tile_n >= n:
        tile_n = n                                   # full dim always legal

    num_d = pl.cdiv(d, tile_d)
    num_n = pl.cdiv(n, tile_n)

    footprint = 4 * tile_n * tile_d * itemsize + 8 * tile_d * 4
    vmem_limit = int(min(phys, footprint + 16 * _MIB))

    # ---- pass 1: per-column max & sum-exp (N axis = reduction, last) -------
    stats = pl.pallas_call(
        _make_stats_kernel(n, tile_n),
        out_shape=jax.ShapeDtypeStruct((2, d), jnp.float32),
        grid_spec=pltpu.PrefetchScalarGridSpec(
            num_scalar_prefetch=1,
            grid=(num_d, num_n),
            in_specs=[pl.BlockSpec((tile_n, tile_d), lambda j, i, expt_sm: (i, j))],
            out_specs=pl.BlockSpec((2, tile_d), lambda j, i, expt_sm: (0, j)),
            scratch_shapes=[pltpu.VMEM((1, tile_d), jnp.float32),
                            pltpu.VMEM((1, tile_d), jnp.float32)],
        ),
        compiler_params=pltpu.CompilerParams(
            dimension_semantics=("parallel", "arbitrary"),
            vmem_limit_bytes=vmem_limit,
        ),
        cost_estimate=pl.CostEstimate(
            flops=4 * n * d,
            transcendentals=n * d,
            bytes_accessed=n * d * itemsize + 2 * d * 4,
        ),
    )(expt_arr, x2d)

    # ---- pass 2: normalize (fully parallel) ---------------------------------
    return pl.pallas_call(
        _normalize_kernel,
        out_shape=jax.ShapeDtypeStruct((n, d), x2d.dtype),
        grid_spec=pltpu.PrefetchScalarGridSpec(
            num_scalar_prefetch=1,
            grid=(num_d, num_n),
            in_specs=[pl.BlockSpec((2, tile_d), lambda j, i, expt_sm: (0, j)),
                      pl.BlockSpec((tile_n, tile_d), lambda j, i, expt_sm: (i, j))],
            out_specs=pl.BlockSpec((tile_n, tile_d), lambda j, i, expt_sm: (i, j)),
        ),
        compiler_params=pltpu.CompilerParams(
            dimension_semantics=("parallel", "parallel"),
            vmem_limit_bytes=vmem_limit,
        ),
        cost_estimate=pl.CostEstimate(
            flops=3 * n * d,
            transcendentals=n * d,
            bytes_accessed=2 * n * d * itemsize + 2 * d * 4,
        ),
    )(expt_arr, stats, x2d)


def exploration_exploitation_softmax(inp, expt, *, force_two_pass=False,
                                     tile_n=None, tile_d=None):
    """softmax(expt * inp, axis=0) — matches nn.Softmax(0)(expt * inp)."""
    orig_shape = inp.shape
    n = int(orig_shape[0])
    x2d = inp.reshape(n, -1)                         # (N, D): softmax axis leading
    d = int(x2d.shape[1])
    itemsize = jnp.dtype(x2d.dtype).itemsize
    expt_arr = jnp.asarray(expt, dtype=jnp.float32).reshape((1,))

    phys = _vmem_capacity_bytes()
    # Double-buffered in+out footprint target, tied to the generation's VMEM
    # (v7x: ~28 MiB; v5e/v6e: 48 MiB cap).
    pipeline_budget = min(phys // 2 - 4 * _MIB, 48 * _MIB)

    # Whole-N-resident design needs 2 bufs x (in+out) even at tile_d=128.
    single_pass_min_bytes = 4 * n * 128 * itemsize
    if force_two_pass or single_pass_min_bytes > pipeline_budget:
        out2d = _two_pass(x2d, expt_arr, n, d, itemsize, pipeline_budget, phys,
                          tile_n=tile_n, tile_d=tile_d)
    else:
        out2d = _single_pass(x2d, expt_arr, n, d, itemsize, pipeline_budget, phys,
                             tile_d=tile_d)
    return out2d.reshape(orig_shape)


# --------------------------------------------------------------------------
# Self-test
# --------------------------------------------------------------------------
if __name__ == "__main__":
    key = jax.random.PRNGKey(0)

    # Deterministic "parameter" from the module __init__ (init_expt).
    init_expt = 2.5

    # Test 1: small (num_actions, batch, features); D = 64 < 128 exercises the
    # masked-lane (partial block) path with no wrapper-side pad/slice.
    x1 = jax.random.normal(key, (8, 4, 16), dtype=jnp.float32)
    out1 = jax.block_until_ready(exploration_exploitation_softmax(x1, init_expt))
    ref1 = jax.nn.softmax(init_expt * x1, axis=0)
    assert out1.shape == x1.shape
    assert jnp.allclose(out1, ref1, atol=1e-5, rtol=1e-5)
    assert jnp.allclose(jnp.sum(out1, axis=0), jnp.ones(x1.shape[1:]), atol=1e-5)

    # Test 2: multi-program grid with a partial last lane block
    # (D = 640 -> tile_d capped at 384 for >=2 programs; last block masked).
    x2 = jax.random.normal(jax.random.fold_in(key, 1), (8, 4, 160), dtype=jnp.float32)
    out2 = jax.block_until_ready(exploration_exploitation_softmax(x2, init_expt))
    ref2 = jax.nn.softmax(init_expt * x2, axis=0)
    assert jnp.allclose(out2, ref2, atol=1e-5, rtol=1e-5)

    # Test 3: force the large-N two-pass fallback on a small, deliberately
    # unaligned shape (N=20 not a multiple of 8, D=100 not a multiple of 128)
    # to validate the online-stats + normalize kernels and their masking.
    x3 = jax.random.normal(jax.random.fold_in(key, 2), (20, 5, 20), dtype=jnp.float32)
    out3 = jax.block_until_ready(
        exploration_exploitation_softmax(x3, init_expt, force_two_pass=True, tile_n=8))
    ref3 = jax.nn.softmax(init_expt * x3, axis=0)
    assert jnp.allclose(out3, ref3, atol=1e-5, rtol=1e-5)
    assert jnp.allclose(jnp.sum(out3, axis=0), jnp.ones(x3.shape[1:]), atol=1e-5)

    print("KERNEL_OK")
</pallas_src>

<mosaic_0001>
module attributes {stable_mosaic.version = 11 : i64} {
  func.func @_ee_softmax_kernel(%arg0: i32, %arg1: memref<1xf32, #tpu.memory_space<smem>>, %arg2: memref<8x128xf32, #tpu.memory_space<vmem>>, %arg3: memref<8x128xf32, #tpu.memory_space<vmem>>) attributes {dimension_semantics = [#tpu.dimension_semantics<parallel>], iteration_bounds = array<i64: 1>, scalar_prefetch = 1 : i64, scratch_operands = 0 : i64, tpu.core_type = #tpu.core_type<tc>, window_params = [{transform_indices = @transform_0, window_bounds = array<i64: 8, 128>}, {transform_indices = @transform_1, window_bounds = array<i64: 8, 128>}]} {
    %c0 = arith.constant 0 : index
    %0 = memref.load %arg1[%c0] : memref<1xf32, #tpu.memory_space<smem>>
    %c0_0 = arith.constant 0 : index
    %c0_1 = arith.constant 0 : index
    %1 = vector.load %arg2[%c0_0, %c0_1] : memref<8x128xf32, #tpu.memory_space<vmem>>, vector<8x128xf32>
    %2 = vector.broadcast %0 : f32 to vector<8x128xf32>
    %3 = arith.mulf %2, %1 : vector<8x128xf32>
    %cst = arith.constant dense<0xFF800000> : vector<128xf32>
    %4 = vector.multi_reduction <maximumf>, %3, %cst [0] : vector<8x128xf32> to vector<128xf32>
    %5 = vector.shape_cast %4 : vector<128xf32> to vector<1x128xf32>
    %6 = vector.broadcast %5 : vector<1x128xf32> to vector<8x128xf32>
    %7 = arith.subf %3, %6 : vector<8x128xf32>
    %8 = math.exp %7 : vector<8x128xf32>
    %cst_2 = arith.constant dense<0.000000e+00> : vector<128xf32>
    %9 = vector.multi_reduction <add>, %8, %cst_2 [0] : vector<8x128xf32> to vector<128xf32>
    %10 = vector.shape_cast %9 : vector<128xf32> to vector<1x128xf32>
    %11 = tpu.reciprocal %10 : vector<1x128xf32> -> vector<1x128xf32>
    %12 = vector.broadcast %11 : vector<1x128xf32> to vector<8x128xf32>
    %13 = arith.mulf %8, %12 : vector<8x128xf32>
    %c0_3 = arith.constant 0 : index
    %c0_4 = arith.constant 0 : index
    %14 = vector.load %arg3[%c0_3, %c0_4] : memref<8x128xf32, #tpu.memory_space<vmem>>, vector<8x128xf32>
    tpu.vector_store %arg3[%c0_3, %c0_4], %13 {strides = array<i32>} : memref<8x128xf32, #tpu.memory_space<vmem>>, vector<8x128xf32>,
    return
  }
  func.func @transform_0(%arg0: i32, %arg1: memref<1xf32, #tpu.memory_space<smem>>) -> (i32, i32) {
    %c0_i32 = arith.constant 0 : i32
    %c0_i32_0 = arith.constant 0 : i32
    return %c0_i32, %arg0 : i32, i32
  }
  func.func @transform_1(%arg0: i32, %arg1: memref<1xf32, #tpu.memory_space<smem>>) -> (i32, i32) {
    %c0_i32 = arith.constant 0 : i32
    %c0_i32_0 = arith.constant 0 : i32
    return %c0_i32, %arg0 : i32, i32
  }
}

</mosaic_0001>

<bundles_post_ra>
// kernel: tpu_custom_call.1
= control target key start
LH: loop header
LB: loop body
LE: loop exit
PB: predicated region body
PF: predicated region fallthrough
CT: control target
= control target key end

     0   :  { %8 = vsyncpa [#allocation5], 0  ;;  %s136_s0 = inlined_call_operand.<no memory space> [shape: f32[1], index: 0, kind: input, shape index: {}]   ;;  %s137_s1 = inlined_call_operand.hbm [shape: f32[8,64], index: 1, kind: input, shape index: {}]   ;;  %s138_s2 = inlined_call_operand.hbm [shape: f32[8,64], index: 2, kind: output, shape index: {}]  }
   0x1   :  { %9 = vsyncpa [#allocation6], 0  ;;  %s110_s9 = smov [#allocation4]  }
   0x2   :  { %s16_s10 = sshll.u32 %s110_s9, 4  ;;  %s17_s10 = int_to_ptr.vmem [resolvable:$true] %s16_s10 }
   0x3   :  { %s74_s11 = scalar_lea.vmem %s17_s10, 128  ;;  %p79_p1 = scmp.lt.s32.totalorder %s17_s10, %s17_s10 }
   0x4   :  { %p75_p0 = scmp.ne.s32.totalorder %s17_s10, %s74_s11  ;;  %p80_p2 = scmp.lt.s32.totalorder %s74_s11, %s74_s11 }
   0x6   :  { %p81_p3 = por %p80_p2, %p79_p1 }
   0x8   :  { %p82_p4 = pnand %p81_p3, %p75_p0 }
   0xa   :  { %85 = shalt.err (!%p82_p4)
}
   0xb   :  { %19 = dma.hbm_to_vmem [thread:$0]  %s137_s1, 128, %s17_s10, [#allocation5]  }
   0xc   :  { %106 = dma.done.wait [#allocation5], 128  }
   0xd   :  { %107 = vsyncadd [#allocation5], 4294967168  ;;  %v25_v0 = vstv %s136_s0  ;;  %v24_v1 = vld [vmem:[#allocation4] sm:$0xff]  ;;  %s111_s0 = smov [#allocation7]  }
   0xe   :  { %v26_v2 = vmul.f32 %v25_v0, %v24_v1  ;;  %s51_s1 = sshll.u32 %s111_s0, 4  ;;  %s52_s1 = int_to_ptr.vmem [resolvable:$true] %s51_s1 }
   0xf   :  { %s86_s16 = scalar_lea.vmem %s52_s1, 128  ;;  %p91_p6 = scmp.lt.s32.totalorder %s52_s1, %s52_s1 }
  0x10   :  { %v27_v3 = vrot.slane %v26_v2, 4  ;;  %p87_p5 = scmp.ne.s32.totalorder %s52_s1, %s86_s16  ;;  %p92_p7 = scmp.lt.s32.totalorder %s86_s16, %s86_s16 }
  0x12   :  { %v28_v4 = vmax.f32 %v26_v2, %v27_v3  ;;  %p93_p8 = por %p92_p7, %p91_p6 }
  0x14   :  { %v29_v5 = vrot.slane %v28_v4, 2  ;;  %p94_p9 = pnand %p93_p8, %p87_p5 }
  0x16   :  { %v30_v6 = vmax.f32 %v28_v4, %v29_v5 }
  0x18   :  { %v31_v7 = vrot.slane %v30_v6, 1 }
  0x1a   :  { %v32_v8 = vmax.f32 %v30_v6, %v31_v7 }
  0x1c   :  { %v33_v9 = vsub.f32 %v26_v2, %v32_v8 }
  0x1e   :  { %v34_v10 = vmul.f32 1.442695, %v33_v9 }
  0x20   :  { %62 = vpow2.f32 %v34_v10 }
  0x2d   :  { %v63_v11 = vpop.eup %62 }
  0x2e   :  { %v36_v12 = vrot.slane %v63_v11, 4 }
  0x30   :  { %v37_v13 = vadd.f32 %v63_v11, %v36_v12 }
  0x32   :  { %v38_v14 = vrot.slane %v37_v13, 2 }
  0x34   :  { %v39_v15 = vadd.f32 %v38_v14, %v37_v13 }
  0x36   :  { %v40_v16 = vrot.slane %v39_v15, 1 }
  0x38   :  { %v41_v17 = vadd.f32 %v40_v16, %v39_v15 }
  0x3a   :  { %64 = vrcp.f32 %v41_v17 }
  0x47   :  { %v65_v18 = vpop.eup %64 }
  0x48   :  { %v43_v19 = vmul.f32 %v65_v18, %v63_v11 }
  0x4a   :  { %44 = vst [vmem:[#allocation7] sm:$0xff] %v43_v19 }
  0x4b   :  { %97 = shalt.err (!%p94_p9)
}
  0x4c   :  { %54 = dma.vmem_to_hbm [thread:$0]  %s52_s1, 128, %s138_s2, [#allocation6]  }
  0x4d   :  { %108 = dma.done.wait [#allocation6], 128  }
  0x4e   :  { %109 = vsyncadd [#allocation6], 4294967168 }
  0x4f   :  { %58 = vsyncpa [#allocation5], 1 }
  0x50   :  { %59 = vsyncpa [#allocation6], 1 }

</bundles_post_ra>
